<compile_context>
chip_gen: v5e
topology: v5e:2x2
jax: 0.10.0
libtpu: 0.0.40
codegen_flags: <defaults>
</compile_context>

<pallas_src>
import jax
import jax.numpy as jnp
from jax.experimental import pallas as pl
from jax.experimental.pallas import tpu as pltpu


def _round_up(x, m):
    return (x + m - 1) // m * m


def _vmem_capacity_bytes():
    # Trace-time hardware query; fall back to the smallest per-core VMEM across
    # supported generations (v7x: 64 MiB) so block sizing is always safe.
    try:
        cap = int(pltpu.get_tpu_info().vmem_capacity_bytes)
        if cap <= 0:
            raise ValueError
        return cap
    except Exception:
        return 64 * 1024 * 1024


def _pick_batch_block(c, v, w, nl, itemsize):
    """Largest batch block B (# of (n,l) slices per grid step) that fits VMEM."""
    cap = _vmem_capacity_bytes()
    # VMEM bytes held per batch slice, accounting for the (8, 128) tile padding
    # of the trailing (C,V)/(V,W)/(C,W) dims of the three blocks.
    per_slice = itemsize * (
        _round_up(c, 8) * _round_up(v, 128)      # x block
        + _round_up(v, 8) * _round_up(w, 128)    # A block
        + _round_up(c, 8) * _round_up(w, 128)    # out block
    )
    budget = cap // 2                            # ~50% of VMEM for the working set
    b = max(1, budget // (2 * per_slice))        # x2: Pallas double buffering
    b = min(b, 2048, nl)
    if b >= 8:
        b = (b // 8) * 8                         # sublane-friendly leading dim
    b = max(1, int(b))
    # Raise the default scoped-VMEM limit but keep ~25% headroom and never
    # exceed 112 MiB (stays well inside physical VMEM on every generation).
    vmem_limit = min(cap * 3 // 4, 112 * 1024 * 1024)
    vmem_limit = max(vmem_limit, min(cap, 32 * 1024 * 1024))
    return b, int(vmem_limit)


def _dy_nconv_kernel(x_ref, a_ref, o_ref):
    # x_ref: (B, C, V), a_ref: (B, V, W), o_ref: (B, C, W).
    # One batched MXU matmul per grid step (jnp.dot is not batched).
    o_ref[...] = jnp.einsum(
        "bcv,bvw->bcw",
        x_ref[...],
        a_ref[...],
        preferred_element_type=jnp.float32,
    ).astype(o_ref.dtype)


def dy_nconv_batch_major(xb, ab):
    """einsum('bcv,bvw->bcw') for batch-major slabs xb:(NL, C, V), ab:(NL, V, W)."""
    nl, c, v = xb.shape
    nl2, v2, w = ab.shape
    assert nl == nl2 and v == v2, "shape mismatch between x and A"

    out_dtype = jnp.result_type(xb.dtype, ab.dtype)
    itemsize = max(jnp.dtype(out_dtype).itemsize, 4)
    block_b, vmem_limit = _pick_batch_block(c, v, w, nl, itemsize)

    # Pad the fused batch axis to a multiple of the block size (zero rows give
    # zero outputs and are sliced off below).
    nl_pad = _round_up(nl, block_b)
    if nl_pad != nl:
        pad = nl_pad - nl
        xb = jnp.pad(xb, ((0, pad), (0, 0), (0, 0)))
        ab = jnp.pad(ab, ((0, pad), (0, 0), (0, 0)))

    ob = pl.pallas_call(
        _dy_nconv_kernel,
        out_shape=jax.ShapeDtypeStruct((nl_pad, c, w), out_dtype),
        grid=(nl_pad // block_b,),
        in_specs=[
            pl.BlockSpec((block_b, c, v), lambda i: (i, 0, 0)),
            pl.BlockSpec((block_b, v, w), lambda i: (i, 0, 0)),
        ],
        out_specs=pl.BlockSpec((block_b, c, w), lambda i: (i, 0, 0)),
        compiler_params=pltpu.CompilerParams(
            # Batch axis is embarrassingly parallel: lets v7x use both TCs.
            dimension_semantics=("parallel",),
            vmem_limit_bytes=vmem_limit,
        ),
    )(xb, ab)

    return ob[:nl] if nl_pad != nl else ob


def dy_nconv(x, A):
    """Pallas equivalent of torch.einsum('ncvl,nvwl->ncwl', (x, A)).contiguous()."""
    n, c, v, l = x.shape
    n2, v2, w, l2 = A.shape
    assert (n, v, l) == (n2, v2, l2), "shape mismatch between x and A"

    # Layout glue (HBM copies done by XLA outside the kernel).  If the
    # surrounding model keeps activations batch-major, call
    # dy_nconv_batch_major() directly and skip these transposes.
    xb = jnp.transpose(x, (0, 3, 1, 2)).reshape(n * l, c, v)    # (N*L, C, V)
    ab = jnp.transpose(A, (0, 3, 1, 2)).reshape(n * l, v, w)    # (N*L, V, W)

    ob = dy_nconv_batch_major(xb, ab)                           # (N*L, C, W)

    # Back to the PyTorch output layout (N, C, W, L).
    return jnp.transpose(ob.reshape(n, l, c, w), (0, 2, 3, 1))


if __name__ == "__main__":
    key = jax.random.PRNGKey(0)
    kx, ka = jax.random.split(key)

    # Small shapes implied by the forward: x:(n, c, v, l), A:(n, v, w, l)
    n, c, v, w, l = 2, 4, 16, 16, 8
    x = jax.random.normal(kx, (n, c, v, l), dtype=jnp.float32)
    A = jax.random.normal(ka, (n, v, w, l), dtype=jnp.float32)

    out = jax.jit(dy_nconv)(x, A)
    out = jax.block_until_ready(out)

    # Reference check against the einsum semantics.
    ref = jnp.einsum("ncvl,nvwl->ncwl", x, A)
    assert out.shape == (n, c, w, l), out.shape
    assert jnp.allclose(out, ref, atol=1e-4, rtol=1e-4), "mismatch vs reference"

    print("KERNEL_OK")
</pallas_src>

<mosaic_0001>
module attributes {stable_mosaic.version = 11 : i64} {
  func.func @_dy_nconv_kernel(%arg0: i32, %arg1: memref<16x4x16xf32, #tpu.memory_space<vmem>>, %arg2: memref<16x16x16xf32, #tpu.memory_space<vmem>>, %arg3: memref<16x4x16xf32, #tpu.memory_space<vmem>>) attributes {dimension_semantics = [#tpu.dimension_semantics<parallel>], iteration_bounds = array<i64: 1>, scalar_prefetch = 0 : i64, scratch_operands = 0 : i64, tpu.core_type = #tpu.core_type<tc>, window_params = [{transform_indices = @transform_0, window_bounds = array<i64: 16, 4, 16>}, {transform_indices = @transform_1, window_bounds = array<i64: 16, 16, 16>}, {transform_indices = @transform_2, window_bounds = array<i64: 16, 4, 16>}]} {
    %c0 = arith.constant 0 : index
    %c0_0 = arith.constant 0 : index
    %c0_1 = arith.constant 0 : index
    %0 = vector.load %arg1[%c0, %c0_0, %c0_1] : memref<16x4x16xf32, #tpu.memory_space<vmem>>, vector<16x4x16xf32>
    %c0_2 = arith.constant 0 : index
    %c0_3 = arith.constant 0 : index
    %c0_4 = arith.constant 0 : index
    %1 = vector.load %arg2[%c0_2, %c0_3, %c0_4] : memref<16x16x16xf32, #tpu.memory_space<vmem>>, vector<16x16x16xf32>
    "tpu.trace_start"() <{level = 10 : i32, message = "bcv,bvw->bcw"}> : () -> ()
    %cst = arith.constant dense<0.000000e+00> : vector<16x4x16xf32>
    %2 = tpu.matmul %0, %1, %cst {dimension_numbers = #tpu.dot_dimension_numbers<[2], [1], [1], [2], [0, 0, 0, 1, 1, 2], [0], [0]>} : vector<16x4x16xf32>, vector<16x16x16xf32>, vector<16x4x16xf32> -> vector<16x4x16xf32>
    "tpu.trace_stop"() : () -> ()
    %c0_5 = arith.constant 0 : index
    %c0_6 = arith.constant 0 : index
    %c0_7 = arith.constant 0 : index
    %3 = vector.load %arg3[%c0_5, %c0_6, %c0_7] : memref<16x4x16xf32, #tpu.memory_space<vmem>>, vector<16x4x16xf32>
    tpu.vector_store %arg3[%c0_5, %c0_6, %c0_7], %2 {strides = array<i32>} : memref<16x4x16xf32, #tpu.memory_space<vmem>>, vector<16x4x16xf32>,
    return
  }
  func.func @transform_0(%arg0: i32) -> (i32, i32, i32) {
    %c0_i32 = arith.constant 0 : i32
    %c0_i32_0 = arith.constant 0 : i32
    %c0_i32_1 = arith.constant 0 : i32
    return %arg0, %c0_i32, %c0_i32_0 : i32, i32, i32
  }
  func.func @transform_1(%arg0: i32) -> (i32, i32, i32) {
    %c0_i32 = arith.constant 0 : i32
    %c0_i32_0 = arith.constant 0 : i32
    %c0_i32_1 = arith.constant 0 : i32
    return %arg0, %c0_i32, %c0_i32_0 : i32, i32, i32
  }
  func.func @transform_2(%arg0: i32) -> (i32, i32, i32) {
    %c0_i32 = arith.constant 0 : i32
    %c0_i32_0 = arith.constant 0 : i32
    %c0_i32_1 = arith.constant 0 : i32
    return %arg0, %c0_i32, %c0_i32_0 : i32, i32, i32
  }
}

</mosaic_0001>

<bundles_post_ra>
// kernel: dy_nconv.1
= control target key start
LH: loop header
LB: loop body
LE: loop exit
PB: predicated region body
PF: predicated region fallthrough
CT: control target
= control target key end

     0   :  { %vm59_vm0 = vcmask 130048   ;;  %vm428_vm1 = vcmask 125952   ;;  %s704_s1 = inlined_call_operand.vmem [shape: f32[16,16,16], index: 1, kind: input, shape index: {}]   ;;  %s705_s0 = inlined_call_operand.vmem [shape: f32[16,4,16], index: 0, kind: input, shape index: {}]   ;;  %s706_s2 = inlined_call_operand.vmem [shape: f32[16,4,16], index: 2, kind: output, shape index: {}]  }
   0x1   :  { %v32_v0 = vld [vmem:[%s704_s1 + $0x28] sm:$0xff]  ;;  %v34_v1 = vld [vmem:[%s704_s1 + $0x38] sm:$0xff]  ;;  %v31_v2 = vld [vmem:[%s704_s1 + $0x20] sm:$0xff] }
   0x2   :  { %123 = vmatpush.msra.mxu2 %v32_v0  ;;  %146 = vmatpush.msra.mxu3 %v34_v1  ;;  %v33_v3 = vld [vmem:[%s704_s1 + $0x30] sm:$0xff]  ;;  %v13_v4 = vld [vmem:[%s705_s0 + $0x8] sm:$0xf]  ;;  %v14_v5 = vld [vmem:[%s705_s0 + $0xc] sm:$0xf] }
   0x3   :  { %v40_v6 = vld [vmem:[%s704_s1 + $0x68] sm:$0xff]  ;;  %v42_v7 = vld [vmem:[%s704_s1 + $0x78] sm:$0xff]  ;;  %v39_v10 = vld [vmem:[%s704_s1 + $0x60] sm:$0xff] }
   0x4   :  { %124 = vmatpush.msra.mxu2 %v31_v2  ;;  %147 = vmatpush.msra.mxu3 %v33_v3  ;;  %v28_v8 = vld [vmem:[%s704_s1 + $0x8] sm:$0xff]  ;;  %v30_v9 = vld [vmem:[%s704_s1 + $0x18] sm:$0xff]  ;;  %v41_v11 = vld [vmem:[%s704_s1 + $0x70] sm:$0xff] }
   0x5   :  { %451 = vmatmul.msk.f32.vlgmr.msra.gmra.mxu2 %vm59_vm0, %v13_v4  ;;  %452 = vmatmul.msk.f32.vlgmr.msra.gmra.mxu3 %vm59_vm0, %v14_v5  ;;  %v27_v12 = vld [vmem:[%s704_s1] sm:$0xff]  ;;  %v29_v13 = vld [vmem:[%s704_s1 + $0x10] sm:$0xff]  ;;  %v36_v16 = vld [vmem:[%s704_s1 + $0x48] sm:$0xff] }
   0x6   :  { %215 = vmatpush.msrb.mxu2 %v40_v6  ;;  %238 = vmatpush.msrb.mxu3 %v42_v7  ;;  %v11_v14 = vld [vmem:[%s705_s0] sm:$0xf]  ;;  %v12_v15 = vld [vmem:[%s705_s0 + $0x4] sm:$0xf]  ;;  %v38_v17 = vld [vmem:[%s704_s1 + $0x58] sm:$0xff] }
   0x7   :  { %77 = vmatpush.msra.mxu0 %v28_v8  ;;  %100 = vmatpush.msra.mxu1 %v30_v9  ;;  %v48_v18 = vld [vmem:[%s704_s1 + $0xa8] sm:$0xff]  ;;  %v50_v19 = vld [vmem:[%s704_s1 + $0xb8] sm:$0xff]  ;;  %v35_v22 = vld [vmem:[%s704_s1 + $0x40] sm:$0xff] }
   0x8   :  { %216 = vmatpush.msrb.mxu2 %v39_v10  ;;  %239 = vmatpush.msrb.mxu3 %v41_v11  ;;  %v17_v20 = vld [vmem:[%s705_s0 + $0x18] sm:$0xf]  ;;  %v18_v21 = vld [vmem:[%s705_s0 + $0x1c] sm:$0xf]  ;;  %v37_v23 = vld [vmem:[%s704_s1 + $0x50] sm:$0xff] }
   0x9   :  { %78 = vmatpush.msra.mxu0 %v27_v12  ;;  %101 = vmatpush.msra.mxu1 %v29_v13  ;;  %v47_v24 = vld [vmem:[%s704_s1 + $0xa0] sm:$0xff]  ;;  %v49_v25 = vld [vmem:[%s704_s1 + $0xb0] sm:$0xff]  ;;  %v44_v26 = vld [vmem:[%s704_s1 + $0x88] sm:$0xff] }
   0xa   :  { %449 = vmatmul.msk.f32.vlgmr.msra.gmra.mxu0 %vm59_vm0, %v11_v14  ;;  %450 = vmatmul.msk.f32.vlgmr.msra.gmra.mxu1 %vm59_vm0, %v12_v15  ;;  %v46_v27 = vld [vmem:[%s704_s1 + $0x98] sm:$0xff]  ;;  %v56_v28 = vld [vmem:[%s704_s1 + $0xe8] sm:$0xff]  ;;  %v15_v30 = vld [vmem:[%s705_s0 + $0x10] sm:$0xf] }
   0xb   :  { %169 = vmatpush.msrb.mxu0 %v36_v16  ;;  %192 = vmatpush.msrb.mxu1 %v38_v17  ;;  %v58_v29 = vld [vmem:[%s704_s1 + $0xf8] sm:$0xff]  ;;  %v16_v31 = vld [vmem:[%s705_s0 + $0x14] sm:$0xf]  ;;  %v43_v32 = vld [vmem:[%s704_s1 + $0x80] sm:$0xff] }
   0xc   :  { %307 = vmatpush.msra.mxu2 %v48_v18  ;;  %330 = vmatpush.msra.mxu3 %v50_v19  ;;  %v45_v33 = vld [vmem:[%s704_s1 + $0x90] sm:$0xff]  ;;  %v55_v34 = vld [vmem:[%s704_s1 + $0xe0] sm:$0xff]  ;;  %v21_v36 = vld [vmem:[%s705_s0 + $0x28] sm:$0xf] }
   0xd   :  { %455 = vmatmul.msk.f32.vlgmr.msrb.gmra.mxu2 %vm59_vm0, %v17_v20  ;;  %456 = vmatmul.msk.f32.vlgmr.msrb.gmra.mxu3 %vm59_vm0, %v18_v21  ;;  %v57_v35 = vld [vmem:[%s704_s1 + $0xf0] sm:$0xff]  ;;  %v22_v37 = vld [vmem:[%s705_s0 + $0x2c] sm:$0xf]  ;;  %v54_v39 = vld [vmem:[%s704_s1 + $0xd8] sm:$0xff] }
   0xe   :  { %170 = vmatpush.msrb.mxu0 %v35_v22  ;;  %193 = vmatpush.msrb.mxu1 %v37_v23  ;;  %v52_v38 = vld [vmem:[%s704_s1 + $0xc8] sm:$0xff]  ;;  %v51_v40 = vld [vmem:[%s704_s1 + $0xc0] sm:$0xff]  ;;  %v53_v41 = vld [vmem:[%s704_s1 + $0xd0] sm:$0xff] }
   0xf   :  { %308 = vmatpush.msra.mxu2 %v47_v24  ;;  %331 = vmatpush.msra.mxu3 %v49_v25  ;;  %v19_v42 = vld [vmem:[%s705_s0 + $0x20] sm:$0xf]  ;;  %v20_v43 = vld [vmem:[%s705_s0 + $0x24] sm:$0xf]  ;;  %v25_v44 = vld [vmem:[%s705_s0 + $0x38] sm:$0xf] }
  0x10   :  { %261 = vmatpush.msra.mxu0 %v44_v26  ;;  %284 = vmatpush.msra.mxu1 %v46_v27  ;;  %v26_v45 = vld [vmem:[%s705_s0 + $0x3c] sm:$0xf]  ;;  %v23_v46 = vld [vmem:[%s705_s0 + $0x30] sm:$0xf]  ;;  %v24_v47 = vld [vmem:[%s705_s0 + $0x34] sm:$0xf] }
  0x11   :  { %399 = vmatpush.msrb.mxu2 %v56_v28  ;;  %422 = vmatpush.msrb.mxu3 %v58_v29 }
  0x12   :  { %453 = vmatmul.msk.f32.vlgmr.msrb.gmra.mxu0 %vm59_vm0, %v15_v30  ;;  %454 = vmatmul.msk.f32.vlgmr.msrb.gmra.mxu1 %vm59_vm0, %v16_v31 }
  0x13   :  { %262 = vmatpush.msra.mxu0 %v43_v32  ;;  %285 = vmatpush.msra.mxu1 %v45_v33 }
  0x14   :  { %400 = vmatpush.msrb.mxu2 %v55_v34  ;;  %423 = vmatpush.msrb.mxu3 %v57_v35 }
  0x15   :  { %459 = vmatmul.msk.f32.vlgmr.msra.gmra.mxu2 %vm59_vm0, %v21_v36  ;;  %460 = vmatmul.msk.f32.vlgmr.msra.gmra.mxu3 %vm59_vm0, %v22_v37 }
  0x16   :  { %353 = vmatpush.msrb.mxu0 %v52_v38  ;;  %376 = vmatpush.msrb.mxu1 %v54_v39 }
  0x18   :  { %354 = vmatpush.msrb.mxu0 %v51_v40  ;;  %377 = vmatpush.msrb.mxu1 %v53_v41 }
  0x1a   :  { %457 = vmatmul.msk.f32.vlgmr.msra.gmra.mxu0 %vm59_vm0, %v19_v42  ;;  %458 = vmatmul.msk.f32.vlgmr.msra.gmra.mxu1 %vm59_vm0, %v20_v43 }
  0x1d   :  { %463 = vmatmul.msk.f32.vlgmr.msrb.gmra.mxu2 %vm59_vm0, %v25_v44  ;;  %464 = vmatmul.msk.f32.vlgmr.msrb.gmra.mxu3 %vm59_vm0, %v26_v45 }
  0x22   :  { %461 = vmatmul.msk.f32.vlgmr.msrb.gmra.mxu0 %vm59_vm0, %v23_v46  ;;  %462 = vmatmul.msk.f32.vlgmr.msrb.gmra.mxu1 %vm59_vm0, %v24_v47 }
  0x87   :  { %v80_v48 = vpop.f32.mrf.mxu0  ;;  %v103_v49 = vpop.f32.mrf.mxu1 }
  0x88   :  { %429 = vst.msk [vmem:[%s706_s2] sm:$0xf] %vm428_vm1, %v80_v48  ;;  %v126_v50 = vpop.f32.mrf.mxu2  ;;  %v149_v51 = vpop.f32.mrf.mxu3 }
  0x89   :  { %430 = vst.msk [vmem:[%s706_s2 + $0x4] sm:$0xf] %vm428_vm1, %v103_v49 }
  0x8a   :  { %431 = vst.msk [vmem:[%s706_s2 + $0x8] sm:$0xf] %vm428_vm1, %v126_v50 }
  0x8b   :  { %432 = vst.msk [vmem:[%s706_s2 + $0xc] sm:$0xf] %vm428_vm1, %v149_v51 }
  0x8f   :  { %v172_v52 = vpop.f32.mrf.mxu0  ;;  %v195_v53 = vpop.f32.mrf.mxu1 }
  0x90   :  { %433 = vst.msk [vmem:[%s706_s2 + $0x10] sm:$0xf] %vm428_vm1, %v172_v52  ;;  %v218_v54 = vpop.f32.mrf.mxu2  ;;  %v241_v55 = vpop.f32.mrf.mxu3 }
  0x91   :  { %434 = vst.msk [vmem:[%s706_s2 + $0x14] sm:$0xf] %vm428_vm1, %v195_v53 }
  0x92   :  { %435 = vst.msk [vmem:[%s706_s2 + $0x18] sm:$0xf] %vm428_vm1, %v218_v54 }
  0x93   :  { %436 = vst.msk [vmem:[%s706_s2 + $0x1c] sm:$0xf] %vm428_vm1, %v241_v55 }
  0x97   :  { %v264_v56 = vpop.f32.mrf.mxu0  ;;  %v287_v57 = vpop.f32.mrf.mxu1 }
  0x98   :  { %437 = vst.msk [vmem:[%s706_s2 + $0x20] sm:$0xf] %vm428_vm1, %v264_v56  ;;  %v310_v58 = vpop.f32.mrf.mxu2  ;;  %v333_v59 = vpop.f32.mrf.mxu3 }
  0x99   :  { %438 = vst.msk [vmem:[%s706_s2 + $0x24] sm:$0xf] %vm428_vm1, %v287_v57 }
  0x9a   :  { %439 = vst.msk [vmem:[%s706_s2 + $0x28] sm:$0xf] %vm428_vm1, %v310_v58 }
  0x9b   :  { %440 = vst.msk [vmem:[%s706_s2 + $0x2c] sm:$0xf] %vm428_vm1, %v333_v59 }
  0x9f   :  { %v356_v60 = vpop.f32.mrf.mxu0  ;;  %v379_v61 = vpop.f32.mrf.mxu1 }
  0xa0   :  { %441 = vst.msk [vmem:[%s706_s2 + $0x30] sm:$0xf] %vm428_vm1, %v356_v60  ;;  %v402_v62 = vpop.f32.mrf.mxu2  ;;  %v425_v63 = vpop.f32.mrf.mxu3 }
  0xa1   :  { %442 = vst.msk [vmem:[%s706_s2 + $0x34] sm:$0xf] %vm428_vm1, %v379_v61 }
  0xa2   :  { %443 = vst.msk [vmem:[%s706_s2 + $0x38] sm:$0xf] %vm428_vm1, %v402_v62 }
  0xa3   :  { %444 = vst.msk [vmem:[%s706_s2 + $0x3c] sm:$0xf] %vm428_vm1, %v425_v63 }

</bundles_post_ra>
